<compile_context>
chip_gen: v6e
topology: v6e:2x2x1
jax: 0.10.0
libtpu: 0.0.40
codegen_flags: <defaults>
</compile_context>

<pallas_src>
import jax
import jax.numpy as jnp
from jax import lax
from jax.experimental import pallas as pl
from jax.experimental.pallas import tpu as pltpu

N_LABELS = 200          # fixed by the module: lab_x = x[:, :, :200, :]
K_NEIGHBORS = 9         # kernel_size * dilation (9 * 1)
BN_EPS = 1e-5


def _round_up(a, m):
    return (a + m - 1) // m * m


def _pick_tile(bn_pad, cap=1024):
    """Largest multiple-of-128 divisor of bn_pad not exceeding cap (lane-dense tiles, no re-padding)."""
    best, t = 128, 128
    while t <= min(bn_pad, cap):
        if bn_pad % t == 0:
            best = t
        t += 128
    return best


# -------------------------- Pallas kernel 1: kNN cosine-similarity (per batch) ----------------------
def _knn_sim_kernel(lab_ref, patch_ref, sim_ref):
    lab = lab_ref[0]        # (C, N)   channels on sublanes, nodes on lanes
    patch = patch_ref[0]    # (C, M)
    eps = 1e-24
    # L2-normalize over channels in f32; rsqrt goes to the EUP slot.
    ln = lab * lax.rsqrt(jnp.maximum(jnp.sum(lab * lab, axis=0, keepdims=True), eps))
    pn = patch * lax.rsqrt(jnp.maximum(jnp.sum(patch * patch, axis=0, keepdims=True), eps))
    # dist = 2 - 2*sim for unit vectors -> top-k nearest == top-k largest sim.
    # bf16 MXU operands, f32 accumulation. Output (N, M): the exact layout lax.top_k consumes,
    # so no HBM transpose is needed after the kernel.
    sim_ref[0] = lax.dot_general(ln.astype(jnp.bfloat16), pn.astype(jnp.bfloat16),
                                 (((0,), (0,)), ((), ())),
                                 preferred_element_type=jnp.float32)   # (N, M)


def knn_sim(lab, patch):
    B, C, N = lab.shape
    M = patch.shape[2]
    return pl.pallas_call(
        _knn_sim_kernel,
        out_shape=jax.ShapeDtypeStruct((B, N, M), jnp.float32),
        grid=(B,),
        in_specs=[pl.BlockSpec((1, C, N), lambda b: (b, 0, 0)),
                  pl.BlockSpec((1, C, M), lambda b: (b, 0, 0))],
        out_specs=pl.BlockSpec((1, N, M), lambda b: (b, 0, 0)),
        compiler_params=pltpu.CompilerParams(dimension_semantics=("parallel",)),
    )(lab, patch)


# ---------------- Pallas kernel 2: graph conv (pre-reduced neighbors) + residual + FFN --------------
def _graph_ffn_kernel(lab_ref, minp_ref,
                      wgl_ref, wga_ref, bg_ref,
                      wf1_ref, bf1_ref,
                      wf2_ref, bf2_ref,
                      out_ref):
    lab_b = lab_ref[...]                                  # (C, T) bf16
    lab = lab_b.astype(jnp.float32)                       # f32 copy for residuals
    minp = minp_ref[...].astype(jnp.float32)              # (C, T)

    # max-relative aggregation: max_k (lab - nbr_k) == lab - min_k nbr_k (min computed in glue)
    agg_b = (lab - minp).astype(jnp.bfloat16)

    # BasicConv([2C, C]) without the (2C,T) concat: two C x C matmuls into one f32 result.
    g = (jnp.dot(wgl_ref[...], lab_b, preferred_element_type=jnp.float32)
         + jnp.dot(wga_ref[...], agg_b, preferred_element_type=jnp.float32)
         + bg_ref[...])
    g = jnp.maximum(g, 0.0)

    # drop_path (identity in eval) + residual with original lab_x
    y = g + lab

    # FFN with BN(eval) folded into weights: conv -> ReLU -> conv -> + shortcut
    h = jnp.dot(wf1_ref[...], y.astype(jnp.bfloat16),
                preferred_element_type=jnp.float32) + bf1_ref[...]
    h = jnp.maximum(h, 0.0)
    z = jnp.dot(wf2_ref[...], h.astype(jnp.bfloat16),
                preferred_element_type=jnp.float32) + bf2_ref[...]
    out_ref[...] = z + y


def graph_ffn(lab_t, minp_t, kp):
    C, BNp = lab_t.shape
    tile = _pick_tile(BNp)
    grid = (BNp // tile,)

    def act_spec(rows):
        return pl.BlockSpec((rows, tile), lambda i: (0, i))

    def const_spec(arr):
        # weights/biases: constant block index -> DMA'd once, kept resident across the grid
        return pl.BlockSpec(arr.shape, lambda i: (0, 0))

    return pl.pallas_call(
        _graph_ffn_kernel,
        out_shape=jax.ShapeDtypeStruct((C, BNp), jnp.float32),
        grid=grid,
        in_specs=[act_spec(C), act_spec(C),
                  const_spec(kp['wg_lab']), const_spec(kp['wg_agg']), const_spec(kp['bg']),
                  const_spec(kp['wf1']), const_spec(kp['bf1']),
                  const_spec(kp['wf2']), const_spec(kp['bf2'])],
        out_specs=act_spec(C),
        compiler_params=pltpu.CompilerParams(dimension_semantics=("parallel",)),
    )(lab_t, minp_t, kp['wg_lab'], kp['wg_agg'], kp['bg'],
      kp['wf1'], kp['bf1'], kp['wf2'], kp['bf2'])


# -------------------------------------- parameters (deterministic) ----------------------------------
def init_params(key, C):
    H = 4 * C
    ks = jax.random.split(key, 6)

    def u(k, shape, fan_in):
        bound = 1.0 / float(fan_in) ** 0.5
        return jax.random.uniform(k, shape, jnp.float32, -bound, bound)

    w_plg = u(ks[0], (C, 2 * C), 2 * C)   # Conv2d(2C, C, 1).weight squeezed -> (out, in)
    b_plg = u(ks[1], (C,), 2 * C)
    wf1 = u(ks[2], (H, C), C)             # Conv2d(C, 4C, 1)
    bf1 = u(ks[3], (H,), C)
    wf2 = u(ks[4], (C, H), H)             # Conv2d(4C, C, 1)
    bf2 = u(ks[5], (C,), H)

    # BatchNorm2d in eval mode with fresh params: gamma=1, beta=0, mean=0, var=1
    g1, be1, m1, v1 = jnp.ones((H,)), jnp.zeros((H,)), jnp.zeros((H,)), jnp.ones((H,))
    g2, be2, m2, v2 = jnp.ones((C,)), jnp.zeros((C,)), jnp.zeros((C,)), jnp.ones((C,))
    s1 = g1 / jnp.sqrt(v1 + BN_EPS); t1 = be1 - m1 * s1
    s2 = g2 / jnp.sqrt(v2 + BN_EPS); t2 = be2 - m2 * s2

    # Fold the eval-mode BN affine into the FFN conv weights/biases (numerically identical in eval).
    wf1_f = wf1 * s1[:, None]
    bf1_f = bf1 * s1 + t1
    wf2_f = wf2 * s2[:, None]
    bf2_f = bf2 * s2 + t2

    # De-interleave the plg conv weight (even input channels <- lab, odd <- aggregation) and split,
    # so the kernel does two C x C matmuls instead of concat + one C x 2C matmul.
    return {
        'wg_lab': w_plg[:, 0::2].astype(jnp.bfloat16),   # (C, C)
        'wg_agg': w_plg[:, 1::2].astype(jnp.bfloat16),   # (C, C)
        'bg': b_plg[:, None],                            # (C, 1) f32
        'wf1': wf1_f.astype(jnp.bfloat16), 'bf1': bf1_f[:, None],   # (4C, C), (4C, 1)
        'wf2': wf2_f.astype(jnp.bfloat16), 'bf2': bf2_f[:, None],   # (C, 4C), (C, 1)
    }


# ----------------------------------------- forward wrapper ------------------------------------------
def grapher_plg_forward(x, kp):
    B, C, Hh, Ww = x.shape
    N = N_LABELS * Ww
    M = (Hh - N_LABELS) * Ww
    K = K_NEIGHBORS
    lab = x[:, :, :N_LABELS, :].reshape(B, C, N).astype(jnp.float32)    # (B, C, N)
    patch = x[:, :, N_LABELS:, :].reshape(B, C, M).astype(jnp.float32)  # (B, C, M)

    # Pallas: normalized inner products in the (B, N, M) layout top_k consumes.
    sim = knn_sim(lab, patch)                                           # (B, N, M)
    # TODO(synk): top-k selection stays as XLA glue (no clean in-kernel Pallas top-k on TPU).
    _, nn_idx = lax.top_k(sim, K)                                       # (B, N, K)

    # XLA glue gather + min-over-K straight from patch (B,C,M): no (B,K,C,M) broadcast, no 4-D
    # transpose, and the (B,C,N,K) intermediate fuses with the reduce so it never hits HBM.
    idx = jnp.broadcast_to(nn_idx.reshape(B, 1, N * K), (B, C, N * K))
    gathered = jnp.take_along_axis(patch, idx, axis=2).reshape(B, C, N, K)
    minp = jnp.min(gathered, axis=3)                                    # (B, C, N)

    # channels-first, batch folded into the lane axis; bf16 halves kernel-2 activation DMA.
    BN = B * N
    lab_t = jnp.transpose(lab, (1, 0, 2)).reshape(C, BN).astype(jnp.bfloat16)
    minp_t = jnp.transpose(minp, (1, 0, 2)).reshape(C, BN).astype(jnp.bfloat16)

    # zero-pad the lane axis to a multiple of 128 so all kernel-2 tiles are lane-dense.
    BN_pad = _round_up(BN, 128)
    if BN_pad != BN:
        lab_t = jnp.pad(lab_t, ((0, 0), (0, BN_pad - BN)))
        minp_t = jnp.pad(minp_t, ((0, 0), (0, BN_pad - BN)))

    out = graph_ffn(lab_t, minp_t, kp)                                  # Pallas: (C, BN_pad) f32
    out = out[:, :BN]
    out = jnp.transpose(out.reshape(C, B, N), (1, 0, 2))                # (B, C, N)
    return out.reshape(B, C, N_LABELS, Ww)


# --------------------------------------- pure-JAX reference -----------------------------------------
# The references mirror the kernels' bf16 matmul-operand casts (f32 accumulation) so the check
# isolates the Pallas plumbing (tiling / padding / weight packing), not mixed-precision drift.
def ref_sim(lab, patch):
    ln = lab * lax.rsqrt(jnp.maximum(jnp.sum(lab * lab, axis=1, keepdims=True), 1e-24))
    pn = patch * lax.rsqrt(jnp.maximum(jnp.sum(patch * patch, axis=1, keepdims=True), 1e-24))
    return jnp.einsum('bcn,bcm->bnm', ln.astype(jnp.bfloat16), pn.astype(jnp.bfloat16),
                      preferred_element_type=jnp.float32)               # (B, N, M)


def ref_post(lab, minp, kp):
    # lab, minp: (B, C, N) f32
    lab_b = lab.astype(jnp.bfloat16)
    lab_f = lab_b.astype(jnp.float32)
    minp_f = minp.astype(jnp.bfloat16).astype(jnp.float32)
    agg_b = (lab_f - minp_f).astype(jnp.bfloat16)
    g = (jnp.einsum('oc,bcn->bon', kp['wg_lab'], lab_b, preferred_element_type=jnp.float32)
         + jnp.einsum('oc,bcn->bon', kp['wg_agg'], agg_b, preferred_element_type=jnp.float32)
         + kp['bg'][None])
    g = jnp.maximum(g, 0.0)
    y = g + lab_f
    h = jnp.einsum('hc,bcn->bhn', kp['wf1'], y.astype(jnp.bfloat16),
                   preferred_element_type=jnp.float32) + kp['bf1'][None]
    h = jnp.maximum(h, 0.0)
    z = jnp.einsum('ch,bhn->bcn', kp['wf2'], h.astype(jnp.bfloat16),
                   preferred_element_type=jnp.float32) + kp['bf2'][None]
    return z + y


# ----------------------------------------------- main -----------------------------------------------
if __name__ == "__main__":
    key = jax.random.PRNGKey(0)
    kx, kparam = jax.random.split(key)

    B, C, Ww = 2, 8, 1
    M_patches = 16                      # must be >= K_NEIGHBORS
    Hh = N_LABELS + M_patches
    x = jax.random.normal(kx, (B, C, Hh, Ww), jnp.float32)
    params = init_params(kparam, C)

    out = grapher_plg_forward(x, params)
    out = jax.block_until_ready(out)
    assert out.shape == (B, C, N_LABELS, Ww)
    assert bool(jnp.all(jnp.isfinite(out)))

    # correctness check vs pure-JAX reference (shares nn_idx to avoid top-k tie ambiguity)
    lab = x[:, :, :N_LABELS, 0].astype(jnp.float32)                     # (B, C, N)
    patch = x[:, :, N_LABELS:, 0].astype(jnp.float32)                   # (B, C, M)
    N = lab.shape[2]
    M = patch.shape[2]
    K = K_NEIGHBORS

    sim_k = jax.block_until_ready(knn_sim(lab, patch))                  # (B, N, M)
    sim_r = ref_sim(lab, patch)                                         # (B, N, M)
    assert bool(jnp.allclose(sim_k, sim_r, atol=2e-3, rtol=2e-3))

    _, nn_idx = lax.top_k(sim_k, K)                                     # (B, N, K)
    idx = jnp.broadcast_to(nn_idx.reshape(B, 1, N * K), (B, C, N * K))
    minp = jnp.take_along_axis(patch, idx, axis=2).reshape(B, C, N, K).min(axis=3)

    out_r = ref_post(lab, minp, params)                                 # (B, C, N)
    assert bool(jnp.allclose(out, out_r.reshape(B, C, N_LABELS, Ww), atol=2e-3, rtol=2e-3))

    print("KERNEL_OK")
</pallas_src>

<mosaic_0001>
module attributes {stable_mosaic.version = 11 : i64} {
  func.func @_knn_sim_kernel(%arg0: i32, %arg1: memref<1x8x200xf32, #tpu.memory_space<vmem>>, %arg2: memref<1x8x16xf32, #tpu.memory_space<vmem>>, %arg3: memref<1x200x16xf32, #tpu.memory_space<vmem>>) attributes {dimension_semantics = [#tpu.dimension_semantics<parallel>], iteration_bounds = array<i64: 2>, scalar_prefetch = 0 : i64, scratch_operands = 0 : i64, tpu.core_type = #tpu.core_type<tc>, window_params = [{transform_indices = @transform_0, window_bounds = array<i64: 1, 8, 200>}, {transform_indices = @transform_1, window_bounds = array<i64: 1, 8, 16>}, {transform_indices = @transform_2, window_bounds = array<i64: 1, 200, 16>}]} {
    %c0 = arith.constant 0 : index
    %c0_0 = arith.constant 0 : index
    %c0_1 = arith.constant 0 : index
    %0 = vector.load %arg1[%c0, %c0_0, %c0_1] : memref<1x8x200xf32, #tpu.memory_space<vmem>>, vector<1x8x200xf32>
    %1 = vector.shape_cast %0 : vector<1x8x200xf32> to vector<8x200xf32>
    %c0_2 = arith.constant 0 : index
    %c0_3 = arith.constant 0 : index
    %c0_4 = arith.constant 0 : index
    %2 = vector.load %arg2[%c0_2, %c0_3, %c0_4] : memref<1x8x16xf32, #tpu.memory_space<vmem>>, vector<1x8x16xf32>
    %3 = vector.shape_cast %2 : vector<1x8x16xf32> to vector<8x16xf32>
    %4 = arith.mulf %1, %1 : vector<8x200xf32>
    %cst = arith.constant dense<0.000000e+00> : vector<200xf32>
    %5 = vector.multi_reduction <add>, %4, %cst [0] : vector<8x200xf32> to vector<200xf32>
    %6 = vector.shape_cast %5 : vector<200xf32> to vector<1x200xf32>
    %cst_5 = arith.constant 1.000000e-24 : f32
    %7 = vector.broadcast %cst_5 : f32 to vector<1x200xf32>
    %8 = arith.maximumf %6, %7 : vector<1x200xf32>
    %9 = math.rsqrt %8 : vector<1x200xf32>
    %10 = vector.broadcast %9 : vector<1x200xf32> to vector<8x200xf32>
    %11 = arith.mulf %1, %10 : vector<8x200xf32>
    %12 = arith.mulf %3, %3 : vector<8x16xf32>
    %cst_6 = arith.constant dense<0.000000e+00> : vector<16xf32>
    %13 = vector.multi_reduction <add>, %12, %cst_6 [0] : vector<8x16xf32> to vector<16xf32>
    %14 = vector.shape_cast %13 : vector<16xf32> to vector<1x16xf32>
    %cst_7 = arith.constant 1.000000e-24 : f32
    %15 = vector.broadcast %cst_7 : f32 to vector<1x16xf32>
    %16 = arith.maximumf %14, %15 : vector<1x16xf32>
    %17 = math.rsqrt %16 : vector<1x16xf32>
    %18 = vector.broadcast %17 : vector<1x16xf32> to vector<8x16xf32>
    %19 = arith.mulf %3, %18 : vector<8x16xf32>
    %20 = arith.truncf %11 : vector<8x200xf32> to vector<8x200xbf16>
    %21 = arith.truncf %19 : vector<8x16xf32> to vector<8x16xbf16>
    %cst_8 = arith.constant dense<0.000000e+00> : vector<200x16xf32>
    %22 = tpu.matmul %20, %21, %cst_8 {dimension_numbers = #tpu.dot_dimension_numbers<[0], [0], [1], [1], [0, 1, 1, 1], [], []>} : vector<8x200xbf16>, vector<8x16xbf16>, vector<200x16xf32> -> vector<200x16xf32>
    %c0_9 = arith.constant 0 : index
    %c0_10 = arith.constant 0 : index
    %c0_11 = arith.constant 0 : index
    %23 = vector.load %arg3[%c0_9, %c0_10, %c0_11] : memref<1x200x16xf32, #tpu.memory_space<vmem>>, vector<1x200x16xf32>
    %24 = vector.shape_cast %23 : vector<1x200x16xf32> to vector<200x16xf32>
    %25 = vector.shape_cast %22 : vector<200x16xf32> to vector<1x200x16xf32>
    tpu.vector_store %arg3[%c0_9, %c0_10, %c0_11], %25 {strides = array<i32>} : memref<1x200x16xf32, #tpu.memory_space<vmem>>, vector<1x200x16xf32>,
    return
  }
  func.func @transform_0(%arg0: i32) -> (i32, i32, i32) {
    %c0_i32 = arith.constant 0 : i32
    %c0_i32_0 = arith.constant 0 : i32
    %c0_i32_1 = arith.constant 0 : i32
    return %arg0, %c0_i32, %c0_i32_0 : i32, i32, i32
  }
  func.func @transform_1(%arg0: i32) -> (i32, i32, i32) {
    %c0_i32 = arith.constant 0 : i32
    %c0_i32_0 = arith.constant 0 : i32
    %c0_i32_1 = arith.constant 0 : i32
    return %arg0, %c0_i32, %c0_i32_0 : i32, i32, i32
  }
  func.func @transform_2(%arg0: i32) -> (i32, i32, i32) {
    %c0_i32 = arith.constant 0 : i32
    %c0_i32_0 = arith.constant 0 : i32
    %c0_i32_1 = arith.constant 0 : i32
    return %arg0, %c0_i32, %c0_i32_0 : i32, i32, i32
  }
}

</mosaic_0001>

<bundles_post_ra>
// kernel: tpu_custom_call.1
= control target key start
LH: loop header
LB: loop body
LE: loop exit
PB: predicated region body
PF: predicated region fallthrough
CT: control target
= control target key end

     0   :  { %7 = vsyncpa [#allocation3], 0  ;;  %s1074_s0 = inlined_call_operand.hbm [shape: f32[2,8,200], index: 0, kind: input, shape index: {}]   ;;  %s1075_s1 = inlined_call_operand.hbm [shape: f32[2,8,16], index: 1, kind: input, shape index: {}]   ;;  %s1076_s2 = inlined_call_operand.vmem [shape: f32[2,200,16], index: 2, kind: output, shape index: {}]  }
   0x1   :  { %9 = vsyncpa [#allocation3 + $0x1], 0 }
   0x2   :  { %10 = vsyncpa [#allocation5], 0 }
   0x3   :  { %12 = vsyncpa [#allocation5 + $0x1], 0  ;;  %s834_s9 = smov 0   ;;  %s836_s10 = smov 0  }
   0x4   :  { %s838_s11 = smov 0   ;;  %s840_s12 = smov 0  }
   0x5 LB: > { %s853_s13 = sadd.s32 4294967295, %s813_s12   ;;  %s856_s14 = sadd.s32 1, %s813_s12   ;;  %s813_s12 = sphi %s840_s12, %s1088_s12   ;;  %s809_s11 = sphi %s838_s11, %s1087_s11   ;;  %s805_s10 = sphi %s836_s10, %s1086_s10   ;;  %s801_s9 = sphi %s834_s9, %s1085_s9  }
   0x6   : > { %s22_s15 = ssub.s32 %s813_s12, %s856_s14  ;;  %s25_s16 = sadd.s32 1, %s809_s11 }
   0x7   : > { %p23_p0 = scmp.eq.s32.totalorder %s22_s15, 0  ;;  %p32_p1 = scmp.ne.s32.totalorder %s809_s11, %s805_s10 }
   0x8   : > { %p33_p2 = scmp.eq.s32.totalorder %s813_s12, 0  ;;  %p38_p3 = scmp.ne.s32.totalorder %s805_s10, %s801_s9 }
   0x9   : > { %s866_s17 = scalar_select %p23_p0, %s809_s11, %s25_s16  }
   0xa   : > { %p34_p4 = por %p33_p2, %p32_p1  ;;  %p39_p5 = scmp.eq.s32.totalorder %s853_s13, 0 }
   0xb   : > { %p677_p6 = scmp.lt.s32.totalorder %s813_s12, 2  ;;  %s875_s19 = sand.u32 1, %s809_s11  }
   0xc   : > { %p870_p7 = por %p39_p5, %p38_p3  ;;  %s570_s20 = sshll.u32 %s875_s19, 4 }
   0xd   : > { %s594_s21 = sshll.u32 %s813_s12, 8  ;;  %s118_s25 = scalar_lea.vmem [#allocation2], %s570_s20 }
   0xe   : > { %s1078_s18 = scalar_select %p870_p7, 1, 0 }
   0xf   : > { %s882_s24 = scalar_lea.hbm %s1074_s0, %s594_s21  ;;  %s126_s26 = sshll.u32 %s118_s25, 4  ;;  %s884_s26 = int_to_ptr.vmem [resolvable:$true] %s126_s26 }
  0x10   : > { %p886_p8 = pnand %p677_p6, %p34_p4  ;;  %s115_s28 = scalar_lea.sflag [#allocation3], %s875_s19 }
  0x11   : > { %s719_s29 = scalar_lea.hbm %s882_s24, 256  ;;  %s724_s4 = scalar_lea.hbm %s1074_s0, 512 }
  0x12   : > { %p720_p11 = scmp.ne.s32.totalorder %s882_s24, %s719_s29  ;;  %p721_p12 = pneg %p886_p8 }
  0x13   : > { %p725_p1 = scmp.lt.s32.totalorder %s882_s24, %s1074_s0  ;;  %p726_p2 = scmp.lt.s32.totalorder %s724_s4, %s719_s29 }
  0x14   : > { %p722_p13 = pnand %p721_p12, %p720_p11 }
  0x15   : > { %p727_p3 = por %p726_p2, %p725_p1 }
  0x16   : > { %p723_p0 = pneg %p722_p13 }
  0x18   : > { %p728_p4 = pnand %p727_p3, %p723_p0 }
  0x1a   : > { %731 = shalt.err (!%p728_p4)
}
  0x1b   : > { %s732_s7 = scalar_lea.vmem %s884_s26, 256  ;;  %s815_s8 = smov [#allocation2]  }
  0x1c   : > { %p733_p5 = scmp.ne.s32.totalorder %s884_s26, %s732_s7  ;;  %s737_s9 = sshll.u32 %s815_s8, 4  ;;  %s738_s9 = int_to_ptr.vmem [resolvable:$false] %s737_s9 }
  0x1d   : > { %s739_s15 = scalar_lea.vmem %s738_s9, 512  ;;  %p740_p13 = scmp.lt.s32.totalorder %s884_s26, %s738_s9 }
  0x1e   : > { %p735_p6 = pnand %p733_p5, %p721_p12  ;;  %p741_p9 = scmp.lt.s32.totalorder %s739_s15, %s732_s7 }
  0x20   : > { %p736_p11 = pneg %p735_p6  ;;  %p742_p10 = por %p741_p9, %p740_p13 }
  0x22   : > { %p743_p1 = pnand %p742_p10, %p736_p11 }
  0x24   : > { %746 = shalt.err (!%p743_p1)
}
  0x25   : > { %673 = dma.hbm_to_vmem [thread:$0]  (!%p886_p8), %s882_s24, 256, %s884_s26, %s115_s28  }
  0x26   : > { %p1080_p0 = scmp.lt.s32.totalorder %s813_s12, 3  ;;  %p1081_p2 = scmp.ge.s32.totalorder %s813_s12, 1 }
  0x27   : > { %s573_s20 = sshll.u32 %s875_s19, 3  ;;  %s574_s21 = sshll.u32 %s813_s12, 7 }
  0x28   : > { %p921_p3 = pnand %p1081_p2, %p1080_p0  ;;  %s930_s25 = scalar_lea.hbm %s1075_s1, %s574_s21 }
  0x29   : > { %s137_s29 = scalar_lea.vmem [#allocation4], %s573_s20  ;;  %s134_s24 = scalar_lea.sflag [#allocation5], %s875_s19 }
  0x2a   : > { %s1082_s16 = scalar_select %p921_p3, 1, 0 }
  0x2b   : > { %s144_s30 = sshll.u32 %s137_s29, 4  ;;  %s747_s26 = scalar_lea.hbm %s930_s25, 128  ;;  %s145_s30 = int_to_ptr.vmem [resolvable:$true] %s144_s30 }
  0x2c   : > { %p748_p9 = scmp.ne.s32.totalorder %s930_s25, %s747_s26  ;;  %s752_s3 = scalar_lea.hbm %s1075_s1, 256 }
  0x2d   : > { %p753_p5 = scmp.lt.s32.totalorder %s930_s25, %s1075_s1  ;;  %p754_p6 = scmp.lt.s32.totalorder %s752_s3, %s747_s26 }
  0x2e   : > { %p750_p10 = pnand %p748_p9, %p721_p12 }
  0x2f   : > { %p755_p11 = por %p754_p6, %p753_p5 }
  0x30   : > { %p751_p4 = pneg %p750_p10 }
  0x32   : > { %p756_p13 = pnand %p755_p11, %p751_p4 }
  0x34   : > { %759 = shalt.err (!%p756_p13)
}
  0x35   : > { %s760_s6 = scalar_lea.vmem %s145_s30, 128  ;;  %s816_s19 = smov [#allocation4]  }
  0x36   : > { %p761_p1 = scmp.ne.s32.totalorder %s145_s30, %s760_s6  ;;  %s765_s7 = sshll.u32 %s816_s19, 4  ;;  %s766_s7 = int_to_ptr.vmem [resolvable:$false] %s765_s7 }
  0x37   : > { %s767_s8 = scalar_lea.vmem %s766_s7, 256  ;;  %p768_p9 = scmp.lt.s32.totalorder %s145_s30, %s766_s7 }
  0x38   : > { %p763_p0 = pnand %p761_p1, %p721_p12  ;;  %p769_p10 = scmp.lt.s32.totalorder %s767_s8, %s760_s6 }
  0x3a   : > { %p764_p2 = pneg %p763_p0  ;;  %p770_p7 = por %p769_p10, %p768_p9 }
  0x3c   : > { %p771_p3 = pnand %p770_p7, %p764_p2 }
  0x3e   : > { %774 = shalt.err (!%p771_p3)
}
  0x3f   : > { %676 = dma.hbm_to_vmem [thread:$0]  (!%p886_p8), %s930_s25, 128, %s145_s30, %s134_s24  }
  0x40   : > { %p1083_p4 = scmp.ne.s32.totalorder %s1082_s16, 0 }
  0x41   : > { %s155_s9 = sand.u32 (!%p1083_p4), 1, %s805_s10   ;;  %p1084_p12 = scmp.ne.s32.totalorder (!%p1083_p4), %s1078_s18, 0 }
  0x42   : > { %153 = sbr.rel (%p1083_p4) target bundleno = 476 (0x1dc), region = 28  ;;  %s576_s15 = sshll.u32 (!%p1083_p4), %s155_s9, 4 }
  0x43   : > { %s156_s20 = scalar_lea.sflag (!%p1083_p4), [#allocation3], %s155_s9  ;;  %s159_s21 = scalar_lea.vmem (!%p1083_p4), [#allocation2], %s576_s15 }
  0x47   : > { %792 = dma.done.wait (%p1084_p12), %s156_s20, 256  }
  0x48   : > { %794 = vsyncadd (%p1084_p12), %s156_s20, 4294967040  ;;  %s577_s22 = sshll.u32 %s155_s9, 3  ;;  %s165_s23 = scalar_lea.sflag [#allocation5], %s155_s9 }
  0x49   : > { %s168_s27 = scalar_lea.vmem [#allocation4], %s577_s22 }
  0x4a   : > { %796 = dma.done.wait (%p1084_p12), %s165_s23, 128  }
  0x4b   : > { %798 = vsyncadd (%p1084_p12), %s165_s23, 4294967168  ;;  %v817_v0 = vmov 0.0   ;;  %vm818_vm0 = vmmov 0   ;;  %v200_v1 = vld [vmem:[%s159_s21] sm:$0xff]  ;;  %vm226_vm1 = vcmask 130048   ;;  %v201_v5 = vld [vmem:[%s159_s21 + $0x8] sm:$0xff] }
  0x4c   : > { %609 = vmatprep.subr.bf16.mxu0 %v817_v0  ;;  %663 = vmatprep.subr.bf16.mxu1 %v817_v0  ;;  %v202_v2 = vld [vmem:[%s168_s27] sm:$0xff]  ;;  %v203_v3 = vmul.f32 %v200_v1, %v200_v1  ;;  %v204_v10 = vmul.f32 %v201_v5, %v201_v5  ;;  %vm211_vm2 = vcmask 588800   ;;  %vm312_vm3 = vcmask 1043456   ;;  %p194_p7 = scmp.lt.s32.totalorder %s853_s13, 1 }
  0x4d   : > { %611 = vmatprep.mubr.msk.bf16.mxu0 %vm818_vm0, %v817_v0  ;;  %639 = vmatprep.mubr.msk.bf16.mxu1 %vm818_vm0, %v817_v0  ;;  %v225_v4 = vmul.f32 %v202_v2, %v202_v2  ;;  %vm272_vm4 = vcmask 64512  }
  0x4e   : > { %v205_v6 = vrot.slane %v203_v3, 4  ;;  %v212_v15 = vsel %vm211_vm2, %v204_v10, 0.0  ;;  %s1090_s13 = smov (!%p194_p7, %s853_s13), 1 }
  0x4f   : > { %v227_v7 = vsel %vm226_vm1, %v225_v4, 0.0  ;;  %v213_v18 = vrot.slane %v212_v15, 4  ;;  %s665_s18 = smul.u32 200, %s1090_s13 }
  0x50   : > { %v228_v8 = vrot.slane %v227_v7, 4  ;;  %v206_v9 = vadd.f32 %v205_v6, %v203_v3 }
  0x51   : > { %v214_v23 = vadd.f32 %v213_v18, %v212_v15  ;;  %s1009_s29 = scalar_lea.vmem %s1076_s2, %s665_s18 }
  0x52   : > { %v229_v11 = vadd.f32 %v228_v8, %v227_v7  ;;  %v207_v12 = vrot.slane %v206_v9, 2 }
  0x53   : > { %v215_v25 = vrot.slane %v214_v23, 2 }
  0x54   : > { %v230_v13 = vrot.slane %v229_v11, 2  ;;  %v208_v14 = vadd.f32 %v207_v12, %v206_v9 }
  0x55   : > { %v216_v26 = vadd.f32 %v215_v25, %v214_v23 }
  0x56   : > { %v231_v16 = vadd.f32 %v230_v13, %v229_v11  ;;  %v209_v17 = vrot.slane %v208_v14, 1 }
  0x57   : > { %v217_v27 = vrot.slane %v216_v26, 1 }
  0x58   : > { %v232_v19 = vrot.slane %v231_v16, 1  ;;  %v210_v20 = vadd.f32 %v209_v17, %v208_v14 }
  0x59   : > { %v218_v31 = vadd.f32 %v217_v27, %v216_v26 }
  0x5a   : > { %v233_v21 = vadd.f32 %v232_v19, %v231_v16  ;;  %v219_v22 = vmax.f32 %v210_v20, 1e-24 }
  0x5b   : > { %v220_v35 = vmax.f32 %v218_v31, 1e-24 }
  0x5c   : > { %v234_v24 = vmax.f32 %v233_v21, 1e-24  ;;  %713 = vrsqrt.f32 %v219_v22 }
  0x5e   : > { %715 = vrsqrt.f32 %v234_v24 }
  0x5f   : > { %717 = vrsqrt.f32 %v220_v35 }
  0x69   : > { %v714_v28 = vpop.eup %713 }
  0x6a   : > { %v223_v29 = vmul.f32 %v714_v28, %v200_v1 }
  0x6b   : > { %v716_v30 = vpop.eup %715 }
  0x6c   : > { %v237_v32 = vpack.c.bf16 %v223_v29, %v223_v29  ;;  %v236_v33 = vmul.f32 %v716_v30, %v202_v2  ;;  %v718_v37 = vpop.eup %717 }
  0x6d   : > { %v224_v38 = vmul.f32 %v718_v37, %v201_v5 }
  0x6e   : > { %240 = vxpose.xlu0.c.b16.start.end [1/1] (short) %v237_v32, 128  ;;  %v239_v34 = vpack.c.bf16 %v236_v33, %v236_v33 }
  0x6f   : > { %v238_v39 = vpack.c.bf16 %v224_v38, %v224_v38 }
  0x70   : > { %v314_v36 = vsel %vm312_vm3, %v239_v34, 0 }
  0x71   : > { %610 = vmatpush3.bf16.msra.mxu0 %v314_v36  ;;  %664 = vmatpush3.bf16.msra.mxu1 %v314_v36 }
  0x8b   : > { %256 = vxpose.xlu0.c.b16.start.end [1/1] (short) (narrow) %v238_v39, 80 }
  0xd0   : > { %v248_v40 = vpop.trf.xlu0 }
  0xd1   : > { %612 = vmatmul.mubr.msk.bf16.vlgmr.msra.gmra.mxu0 %vm272_vm4, %v248_v40 }
  0xd2   : > { %615 = vmatprep.mubr.msk.bf16.mxu0 %vm818_vm0, %v817_v0 }
  0xd4   : > { %v249_v41 = vpop.trf.xlu0 }
  0xd8   : > { %v250_v42 = vpop.trf.xlu0 }
  0xd9   : > { %616 = vmatmul.mubr.msk.bf16.gmra.mxu0 %vm272_vm4, %v249_v41 }
  0xda   : > { %619 = vmatprep.mubr.msk.bf16.mxu0 %vm818_vm0, %v817_v0 }
  0xdc   : > { %v251_v43 = vpop.trf.xlu0 }
  0xe0   : > { %v252_v44 = vpop.trf.xlu0 }
  0xe1   : > { %620 = vmatmul.mubr.msk.bf16.gmra.mxu0 %vm272_vm4, %v250_v42 }
  0xe2   : > { %623 = vmatprep.mubr.msk.bf16.mxu0 %vm818_vm0, %v817_v0 }
  0xe4   : > { %v253_v45 = vpop.trf.xlu0 }
  0xe8   : > { %v254_v46 = vpop.trf.xlu0 }
  0xe9   : > { %624 = vmatmul.mubr.msk.bf16.gmra.mxu0 %vm272_vm4, %v251_v43 }
  0xea   : > { %627 = vmatprep.mubr.msk.bf16.mxu0 %vm818_vm0, %v817_v0 }
  0xec   : > { %v255_v47 = vpop.trf.xlu0 }
  0xed   : > { %640 = vmatmul.mubr.msk.bf16.vlgmr.msra.gmra.mxu1 %vm272_vm4, %v255_v47 }
  0xee   : > { %643 = vmatprep.mubr.msk.bf16.mxu1 %vm818_vm0, %v817_v0 }
  0xf0   : > { %v264_v48 = vpop.trf.xlu0 }
  0xf1   : > { %628 = vmatmul.mubr.msk.bf16.gmra.mxu0 %vm272_vm4, %v252_v44 }
  0xf2   : > { %631 = vmatprep.mubr.msk.bf16.mxu0 %vm818_vm0, %v817_v0 }
  0xf4   : > { %v265_v49 = vpop.trf.xlu0 }
  0xf5   : > { %644 = vmatmul.mubr.msk.bf16.gmra.mxu1 %vm272_vm4, %v264_v48 }
  0xf6   : > { %647 = vmatprep.mubr.msk.bf16.mxu1 %vm818_vm0, %v817_v0 }
  0xf8   : > { %v266_v50 = vpop.trf.xlu0 }
  0xf9   : > { %632 = vmatmul.mubr.msk.bf16.gmra.mxu0 %vm272_vm4, %v253_v45 }
  0xfa   : > { %635 = vmatprep.mubr.msk.bf16.mxu0 %vm818_vm0, %v817_v0 }
  0xfc   : > { %v267_v51 = vpop.trf.xlu0 }
  0xfd   : > { %648 = vmatmul.mubr.msk.bf16.gmra.mxu1 %vm272_vm4, %v265_v49 }
  0xfe   : > { %651 = vmatprep.mubr.msk.bf16.mxu1 %vm818_vm0, %v817_v0 }
 0x100   : > { %v268_v52 = vpop.trf.xlu0 }
 0x101   : > { %636 = vmatmul.mubr.msk.bf16.gmra.mxu0 %vm272_vm4, %v254_v46 }
 0x105   : > { %652 = vmatmul.mubr.msk.bf16.gmra.mxu1 %vm272_vm4, %v266_v50 }
 0x106   : > { %655 = vmatprep.mubr.msk.bf16.mxu1 %vm818_vm0, %v817_v0 }
 0x10d   : > { %656 = vmatmul.mubr.msk.bf16.gmra.mxu1 %vm272_vm4, %v267_v51 }
 0x10e   : > { %659 = vmatprep.mubr.msk.bf16.mxu1 %vm818_vm0, %v817_v0 }
 0x115   : > { %660 = vmatmul.mubr.msk.bf16.gmra.mxu1 %vm272_vm4, %v268_v52 }
 0x191   : > { %v350_v53 = vpop.f32.mrf.mxu0 }
 0x192   : > { %452 = vst.msk [vmem:[%s1009_s29] sm:$0xff] %vm226_vm1, %v350_v53 }
 0x193   : > { %v613_v54 = vpop.f32.mrf.mxu0 }
 0x195   : > { %v353_v55 = vpop.f32.mrf.mxu0 }
 0x196   : > { %453 = vst.msk [vmem:[%s1009_s29 + $0x8] sm:$0xff] %vm226_vm1, %v353_v55 }
 0x197   : > { %v614_v56 = vpop.f32.mrf.mxu0 }
 0x199   : > { %v358_v57 = vpop.f32.mrf.mxu0 }
 0x19a   : > { %454 = vst.msk [vmem:[%s1009_s29 + $0x10] sm:$0xff] %vm226_vm1, %v358_v57 }
 0x19b   : > { %v617_v58 = vpop.f32.mrf.mxu0 }
 0x19d   : > { %v361_v59 = vpop.f32.mrf.mxu0 }
 0x19e   : > { %455 = vst.msk [vmem:[%s1009_s29 + $0x18] sm:$0xff] %vm226_vm1, %v361_v59 }
 0x19f   : > { %v618_v60 = vpop.f32.mrf.mxu0 }
 0x1a1   : > { %v366_v61 = vpop.f32.mrf.mxu0 }
 0x1a2   : > { %456 = vst.msk [vmem:[%s1009_s29 + $0x20] sm:$0xff] %vm226_vm1, %v366_v61 }
 0x1a3   : > { %v621_v62 = vpop.f32.mrf.mxu0 }
 0x1a5   : > { %v369_v63 = vpop.f32.mrf.mxu0 }
 0x1a6   : > { %457 = vst.msk [vmem:[%s1009_s29 + $0x28] sm:$0xff] %vm226_vm1, %v369_v63 }
 0x1a7   : > { %v622_v0 = vpop.f32.mrf.mxu0 }
 0x1a9   : > { %v374_v1 = vpop.f32.mrf.mxu0 }
 0x1aa   : > { %458 = vst.msk [vmem:[%s1009_s29 + $0x30] sm:$0xff] %vm226_vm1, %v374_v1 }
 0x1ab   : > { %v625_v2 = vpop.f32.mrf.mxu0 }
 0x1ad   : > { %v377_v3 = vpop.f32.mrf.mxu0  ;;  %v406_v4 = vpop.f32.mrf.mxu1 }
 0x1ae   : > { %459 = vst.msk [vmem:[%s1009_s29 + $0x38] sm:$0xff] %vm226_vm1, %v377_v3  ;;  %466 = vst.msk [vmem:[%s1009_s29 + $0x70] sm:$0xff] %vm226_vm1, %v406_v4 }
 0x1af   : > { %v626_v5 = vpop.f32.mrf.mxu0  ;;  %v641_v6 = vpop.f32.mrf.mxu1 }
 0x1b1   : > { %v382_v7 = vpop.f32.mrf.mxu0  ;;  %v409_v8 = vpop.f32.mrf.mxu1 }
 0x1b2   : > { %460 = vst.msk [vmem:[%s1009_s29 + $0x40] sm:$0xff] %vm226_vm1, %v382_v7  ;;  %467 = vst.msk [vmem:[%s1009_s29 + $0x78] sm:$0xff] %vm226_vm1, %v409_v8 }
 0x1b3   : > { %v629_v9 = vpop.f32.mrf.mxu0  ;;  %v642_v10 = vpop.f32.mrf.mxu1 }
 0x1b5   : > { %v385_v11 = vpop.f32.mrf.mxu0  ;;  %v414_v12 = vpop.f32.mrf.mxu1 }
 0x1b6   : > { %461 = vst.msk [vmem:[%s1009_s29 + $0x48] sm:$0xff] %vm226_vm1, %v385_v11  ;;  %468 = vst.msk [vmem:[%s1009_s29 + $0x80] sm:$0xff] %vm226_vm1, %v414_v12 }
 0x1b7   : > { %v630_v13 = vpop.f32.mrf.mxu0  ;;  %v645_v14 = vpop.f32.mrf.mxu1 }
 0x1b9   : > { %v390_v15 = vpop.f32.mrf.mxu0  ;;  %v417_v16 = vpop.f32.mrf.mxu1 }
 0x1ba   : > { %462 = vst.msk [vmem:[%s1009_s29 + $0x50] sm:$0xff] %vm226_vm1, %v390_v15  ;;  %469 = vst.msk [vmem:[%s1009_s29 + $0x88] sm:$0xff] %vm226_vm1, %v417_v16 }
 0x1bb   : > { %v633_v17 = vpop.f32.mrf.mxu0  ;;  %v646_v18 = vpop.f32.mrf.mxu1 }
 0x1bd   : > { %v393_v19 = vpop.f32.mrf.mxu0  ;;  %v422_v20 = vpop.f32.mrf.mxu1 }
 0x1be   : > { %463 = vst.msk [vmem:[%s1009_s29 + $0x58] sm:$0xff] %vm226_vm1, %v393_v19  ;;  %470 = vst.msk [vmem:[%s1009_s29 + $0x90] sm:$0xff] %vm226_vm1, %v422_v20 }
 0x1bf   : > { %v634_v21 = vpop.f32.mrf.mxu0  ;;  %v649_v22 = vpop.f32.mrf.mxu1 }
 0x1c1   : > { %v398_v23 = vpop.f32.mrf.mxu0  ;;  %v425_v24 = vpop.f32.mrf.mxu1 }
 0x1c2   : > { %464 = vst.msk [vmem:[%s1009_s29 + $0x60] sm:$0xff] %vm226_vm1, %v398_v23  ;;  %471 = vst.msk [vmem:[%s1009_s29 + $0x98] sm:$0xff] %vm226_vm1, %v425_v24 }
 0x1c3   : > { %v637_v25 = vpop.f32.mrf.mxu0  ;;  %v650_v26 = vpop.f32.mrf.mxu1 }
 0x1c5   : > { %v401_v27 = vpop.f32.mrf.mxu0  ;;  %v430_v28 = vpop.f32.mrf.mxu1 }
 0x1c6   : > { %465 = vst.msk [vmem:[%s1009_s29 + $0x68] sm:$0xff] %vm226_vm1, %v401_v27  ;;  %472 = vst.msk [vmem:[%s1009_s29 + $0xa0] sm:$0xff] %vm226_vm1, %v430_v28 }
 0x1c7   : > { %v638_v29 = vpop.f32.mrf.mxu0  ;;  %v653_v30 = vpop.f32.mrf.mxu1 }
 0x1c9   : > { %v433_v31 = vpop.f32.mrf.mxu1 }
 0x1ca   : > { %473 = vst.msk [vmem:[%s1009_s29 + $0xa8] sm:$0xff] %vm226_vm1, %v433_v31 }
 0x1cb   : > { %v654_v32 = vpop.f32.mrf.mxu1 }
 0x1cd   : > { %v438_v33 = vpop.f32.mrf.mxu1 }
 0x1ce   : > { %474 = vst.msk [vmem:[%s1009_s29 + $0xb0] sm:$0xff] %vm226_vm1, %v438_v33 }
 0x1cf   : > { %v657_v34 = vpop.f32.mrf.mxu1 }
 0x1d1   : > { %v441_v35 = vpop.f32.mrf.mxu1 }
 0x1d2   : > { %475 = vst.msk [vmem:[%s1009_s29 + $0xb8] sm:$0xff] %vm226_vm1, %v441_v35 }
 0x1d3   : > { %v658_v36 = vpop.f32.mrf.mxu1 }
 0x1d5   : > { %v446_v37 = vpop.f32.mrf.mxu1 }
 0x1d6   : > { %476 = vst.msk [vmem:[%s1009_s29 + $0xc0] sm:$0xff] %vm226_vm1, %v446_v37 }
 0x1d7   : > { %v661_v38 = vpop.f32.mrf.mxu1 }
 0x1d9   : > { %v449_v39 = vpop.f32.mrf.mxu1 }
 0x1db   : > { %v662_v40 = vpop.f32.mrf.mxu1 }
 0x1dc PF: > { %p15_p8 = scmp.ge.s32.totalorder %s856_s14, 4   ;;  %s1085_s9 = smov %s805_s10 }
 0x1dd   : > { %s1086_s10 = smov %s809_s11  ;;  %s1087_s11 = smov %s866_s17 }
 0x1de   : > { %s1088_s12 = smov %s856_s14  ;;  %17 = sbr.rel (!%p15_p8) target bundleno = 5 (0x5), region = 81 }
 0x1e3   :  { %498 = vsyncpa [#allocation3], 1 }
 0x1e4   :  { %500 = vsyncpa [#allocation3 + $0x1], 1 }
 0x1e5   :  { %501 = vsyncpa [#allocation5], 1 }
 0x1e6   :  { %503 = vsyncpa [#allocation5 + $0x1], 1 }

</bundles_post_ra>
